<compile_context>
chip_gen: v5e
topology: v5e:2x2
jax: 0.10.0
libtpu: 0.0.40
codegen_flags: <defaults>
</compile_context>

<pallas_src>
import functools

import jax
import jax.numpy as jnp
from jax import lax
from jax.experimental import pallas as pl
from jax.experimental.pallas import tpu as pltpu


def _vmem_limit_bytes():
    """Per-generation scoped-VMEM budget: ~75% of physical, capped at 100 MiB."""
    try:
        cap = int(pltpu.get_tpu_info().vmem_capacity_bytes)
    except Exception:  # pragma: no cover - older jax / interpret mode
        cap = 64 * 1024 * 1024  # v7x-safe fallback
    return max(16 * 1024 * 1024, min(cap * 3 // 4, 100 * 1024 * 1024))


# ------------------------------------------------------------------
# 0) one-shot weight-masking prep kernel (runs once per forward, not per grid step)
#    masked_W = reference_W * (frozen + baseline * weight_mask), emitted as bf16 for the MXU.
#    MLP weights reuse the same kernel with frozen=0, baseline=1  =>  W * mask.
# ------------------------------------------------------------------

def _mask_weight_kernel(w_ref, m_ref, froz_ref, base_ref, out_ref):
    mask = froz_ref[...] + base_ref[...] * m_ref[...].astype(jnp.float32)
    out_ref[...] = (w_ref[...].astype(jnp.float32) * mask).astype(jnp.bfloat16)


def mask_weight(w, m, frozen, baseline):
    # TODO(synk): tile over rows for production-size weights that exceed VMEM.
    return pl.pallas_call(
        _mask_weight_kernel,
        out_shape=jax.ShapeDtypeStruct(w.shape, jnp.bfloat16),
        compiler_params=pltpu.CompilerParams(vmem_limit_bytes=_vmem_limit_bytes()),
    )(w, m, frozen, baseline)


# ------------------------------------------------------------------
# 1) fused attention block kernel: LN1 -> causal MHA (pre-masked weights) -> residual
# ------------------------------------------------------------------

def _attn_block_kernel(x_ref, wqkv_ref, bqkv_ref, wo_ref, bo_ref,
                       ln_w_ref, ln_b_ref, out_ref, *, n_heads, d_head, eps):
    x = x_ref[0]                                   # (S, D) f32
    S, D = x.shape
    HE = n_heads * d_head

    # --- LayerNorm (ln1), f32 ---
    mu = jnp.mean(x, axis=-1, keepdims=True)
    xc = x - mu
    var = jnp.mean(xc * xc, axis=-1, keepdims=True)
    xn = xc * lax.rsqrt(var + eps)
    xn = xn * ln_w_ref[...] + ln_b_ref[...]

    # --- one (S, D) x (D, 3*H*E) projection produces Q, K, V for all heads ---
    qkv = jnp.dot(xn.astype(jnp.bfloat16), wqkv_ref[...],
                  preferred_element_type=jnp.float32) + bqkv_ref[...]     # (S, 3HE) f32

    # --- head-batched scores / softmax / PV (no per-head Python loop) ---
    qkv3 = jnp.transpose(qkv.reshape(S, 3 * n_heads, d_head), (1, 0, 2))  # (3H, S, E)
    q = qkv3[0:n_heads].astype(jnp.bfloat16)                              # (H, S, E)
    k = qkv3[n_heads:2 * n_heads].astype(jnp.bfloat16)
    v = qkv3[2 * n_heads:3 * n_heads].astype(jnp.bfloat16)

    scale = jnp.float32(1.0 / (float(d_head) ** 0.5))
    s = jnp.einsum('hqe,hke->hqk', q, k,
                   preferred_element_type=jnp.float32) * scale            # (H, S, S)

    qi = lax.broadcasted_iota(jnp.int32, (S, S), 0)
    ki = lax.broadcasted_iota(jnp.int32, (S, S), 1)
    causal = (qi >= ki)[None, :, :]
    s = jnp.where(causal, s, jnp.float32(-1e30))
    m = jnp.max(s, axis=-1, keepdims=True)
    p = jnp.exp(s - m)
    l = jnp.sum(p, axis=-1, keepdims=True)
    probs = p * pl.reciprocal(l, approx=True)          # EUP slot, not a VALU divide

    z = jnp.einsum('hqk,hke->hqe', probs.astype(jnp.bfloat16), v,
                   preferred_element_type=jnp.float32)                    # (H, S, E)
    z = jnp.transpose(z, (1, 0, 2)).reshape(S, HE)                        # (S, H*E)

    # --- one (S, H*E) x (H*E, D) output projection ---
    attn_out = jnp.dot(z.astype(jnp.bfloat16), wo_ref[...],
                       preferred_element_type=jnp.float32) + bo_ref[...]
    out_ref[0] = x + attn_out                          # residual add


def attention_block(x, w_qkv, b_qkv, w_o, b_o, ln_w, ln_b, *, n_heads, d_head):
    B, S, D = x.shape
    HE = n_heads * d_head
    HE3 = w_qkv.shape[1]
    kernel = functools.partial(_attn_block_kernel, n_heads=n_heads, d_head=d_head, eps=1e-5)

    def full(shape):
        return pl.BlockSpec(shape, lambda b, _n=len(shape): (0,) * _n)

    # TODO(synk): flash-style KV tiling + query-row tiles of 128/256 for production S.
    return pl.pallas_call(
        kernel,
        out_shape=jax.ShapeDtypeStruct((B, S, D), jnp.float32),
        grid=(B,),
        in_specs=[
            pl.BlockSpec((1, S, D), lambda b: (b, 0, 0)),      # x
            full((D, HE3)), full((1, HE3)),                    # masked W_qkv (bf16), b_qkv
            full((HE, D)), full((1, D)),                       # masked W_O (bf16), b_O
            full((1, D)), full((1, D)),                        # ln1_w, ln1_b
        ],
        out_specs=pl.BlockSpec((1, S, D), lambda b: (b, 0, 0)),
        compiler_params=pltpu.CompilerParams(
            dimension_semantics=("parallel",),                 # batch rows are independent
            vmem_limit_bytes=_vmem_limit_bytes()),
    )(x, w_qkv, b_qkv, w_o, b_o, ln_w, ln_b)


# ------------------------------------------------------------------
# 2) fused MLP block kernel on the flattened token axis: LN2 -> GELU MLP -> residual
# ------------------------------------------------------------------

def _mlp_block_kernel(x_ref, w_in_ref, b_in_ref, w_out_ref, b_out_ref,
                      ln_w_ref, ln_b_ref, out_ref, *, eps):
    x = x_ref[...]                                 # (TR, D) f32 row tile
    mu = jnp.mean(x, axis=-1, keepdims=True)
    xc = x - mu
    var = jnp.mean(xc * xc, axis=-1, keepdims=True)
    xn = xc * lax.rsqrt(var + eps)
    xn = xn * ln_w_ref[...] + ln_b_ref[...]

    pre = jnp.dot(xn.astype(jnp.bfloat16), w_in_ref[...],
                  preferred_element_type=jnp.float32) + b_in_ref[...]
    act = jax.nn.gelu(pre, approximate=True)       # TransformerLens gelu_new (tanh approx)

    mlp_out = jnp.dot(act.astype(jnp.bfloat16), w_out_ref[...],
                      preferred_element_type=jnp.float32) + b_out_ref[...]
    out_ref[...] = x + mlp_out                     # residual add


def _row_tile(rows):
    for t in (256, 128):                           # MXU-width row tiles (v6e/v7x then v5e)
        if rows % t == 0:
            return t
    return rows                                    # small demo / ragged fallback: single block


def mlp_block(x2d, w_in, b_in, w_out, b_out, ln_w, ln_b):
    R, D = x2d.shape
    d_mlp = w_in.shape[1]
    TR = _row_tile(R)
    kernel = functools.partial(_mlp_block_kernel, eps=1e-5)

    def full(shape):
        return pl.BlockSpec(shape, lambda r, _n=len(shape): (0,) * _n)

    # TODO(synk): for production d_mlp, add a d_mlp reduction grid axis with an f32 VMEM
    #             accumulator instead of full-array weight blocks.
    return pl.pallas_call(
        kernel,
        out_shape=jax.ShapeDtypeStruct((R, D), jnp.float32),
        grid=(pl.cdiv(R, TR),),
        in_specs=[
            pl.BlockSpec((TR, D), lambda r: (r, 0)),           # token rows
            full((D, d_mlp)), full((1, d_mlp)),                # masked W_in (bf16), b_in
            full((d_mlp, D)), full((1, D)),                    # masked W_out (bf16), b_out
            full((1, D)), full((1, D)),                        # ln2_w, ln2_b
        ],
        out_specs=pl.BlockSpec((TR, D), lambda r: (r, 0)),
        compiler_params=pltpu.CompilerParams(
            dimension_semantics=("parallel",),
            vmem_limit_bytes=_vmem_limit_bytes()),
    )(x2d, w_in, b_in, w_out, b_out, ln_w, ln_b)


# ------------------------------------------------------------------
# 3) WeightMaskedLayer.forward equivalent
# ------------------------------------------------------------------

def weight_masked_layer_forward(x, params, attn_masks, mlp_masks):
    """attn_masks[comp] = (W_frozen (H,), W_baseline (H,), weight_mask same shape as W);
       mlp_masks[comp]  = weight_mask (same shape as W)."""
    H, D, E = params["W_Q"].shape
    HE = H * E
    B, S, _ = x.shape

    def to_cols(w):               # (H, D, E) -> (D, H*E); column index = h*E + e
        return jnp.transpose(w, (1, 0, 2)).reshape(D, HE)

    def per_col(v):               # (H,) -> (1, H*E), per-head value repeated over d_head
        return jnp.repeat(v, E).reshape(1, HE).astype(jnp.float32)

    # ---- fused QKV layout (lane-dense) ----
    wq, mq, fq, bq, biasq = [], [], [], [], []
    for comp, bias in (("W_Q", "b_Q"), ("W_K", "b_K"), ("W_V", "b_V")):
        frozen, baseline, wmask = attn_masks[comp]
        wq.append(to_cols(params[comp]))
        mq.append(to_cols(wmask))
        fq.append(per_col(frozen))
        bq.append(per_col(baseline))
        biasq.append(params[bias].reshape(1, HE))
    w_qkv = jnp.concatenate(wq, axis=1)                            # (D, 3*H*E) bf16
    m_qkv = jnp.concatenate(mq, axis=1)                            # (D, 3*H*E) bf16
    froz_qkv = jnp.concatenate(fq, axis=1)                         # (1, 3*H*E) f32
    base_qkv = jnp.concatenate(bq, axis=1)                         # (1, 3*H*E) f32
    b_qkv = jnp.concatenate(biasq, axis=1).astype(jnp.float32)

    # ---- W_O layout ----
    frozen_o, baseline_o, wmask_o = attn_masks["W_O"]
    w_o = params["W_O"].reshape(HE, D)                             # row index = h*E + e
    m_o = wmask_o.reshape(HE, D)
    froz_o = jnp.repeat(frozen_o, E).reshape(HE, 1).astype(jnp.float32)
    base_o = jnp.repeat(baseline_o, E).reshape(HE, 1).astype(jnp.float32)

    # ---- one-shot masked-weight prep (activation independent, done once per forward) ----
    zero1 = jnp.zeros((1, 1), jnp.float32)
    one1 = jnp.ones((1, 1), jnp.float32)
    w_qkv_m = mask_weight(w_qkv, m_qkv, froz_qkv, base_qkv)
    w_o_m = mask_weight(w_o, m_o, froz_o, base_o)
    w_in_m = mask_weight(params["W_in"], mlp_masks["W_in"], zero1, one1)
    w_out_m = mask_weight(params["W_out"], mlp_masks["W_out"], zero1, one1)

    # ---- LN1 -> masked causal MHA -> residual ----
    resid = attention_block(
        x, w_qkv_m, b_qkv, w_o_m, params["b_O"],
        params["ln1_w"], params["ln1_b"], n_heads=H, d_head=E)

    # ---- LN2 -> masked GELU MLP -> residual, on the flattened (B*S) token axis ----
    out2d = mlp_block(
        resid.reshape(B * S, D), w_in_m, params["b_in"], w_out_m, params["b_out"],
        params["ln2_w"], params["ln2_b"])
    return out2d.reshape(B, S, D)


# ------------------------------------------------------------------
# 4) deterministic setup + run
# ------------------------------------------------------------------

if __name__ == "__main__":
    B, S, D, H, E = 2, 8, 32, 4, 8
    d_mlp = 4 * D

    key = jax.random.PRNGKey(0)
    ks = jax.random.split(key, 20)

    def w(k, shape, dtype=jnp.bfloat16):
        return (0.02 * jax.random.normal(k, shape, jnp.float32)).astype(dtype)

    # reference weights (cloned tl_layer params, torch_dtype=bfloat16)
    params = {
        "W_Q": w(ks[0], (H, D, E)), "W_K": w(ks[1], (H, D, E)),
        "W_V": w(ks[2], (H, D, E)), "W_O": w(ks[3], (H, E, D)),
        "W_in": w(ks[4], (D, d_mlp)), "W_out": w(ks[5], (d_mlp, D)),
        "b_Q": 0.01 * jax.random.normal(ks[6], (H, E), jnp.float32),
        "b_K": 0.01 * jax.random.normal(ks[7], (H, E), jnp.float32),
        "b_V": 0.01 * jax.random.normal(ks[8], (H, E), jnp.float32),
        "b_O": 0.01 * jax.random.normal(ks[9], (1, D), jnp.float32),
        "b_in": 0.01 * jax.random.normal(ks[10], (1, d_mlp), jnp.float32),
        "b_out": 0.01 * jax.random.normal(ks[11], (1, D), jnp.float32),
        "ln1_w": jnp.ones((1, D), jnp.float32), "ln1_b": jnp.zeros((1, D), jnp.float32),
        "ln2_w": jnp.ones((1, D), jnp.float32), "ln2_b": jnp.zeros((1, D), jnp.float32),
    }

    # attn_mask_dict: frozen heads per component (make_partly_differentiable_mask)
    frozen_heads = {"W_Q": [0], "W_K": [1], "W_V": [0, 2], "W_O": [3]}
    attn_masks = {}
    mask_keys = jax.random.split(ks[12], 4)
    for i, comp in enumerate(("W_Q", "W_K", "W_V", "W_O")):
        frozen = jnp.zeros((H,), jnp.float32).at[jnp.array(frozen_heads[comp])].set(1.0)
        baseline = 1.0 - frozen                      # W_baseline init = (~W_frozen).float()
        # module __init__ uses torch.ones_like; deterministic values in [0,1] here to
        # exercise the masking path (as after a few training steps).
        wmask = jax.random.uniform(mask_keys[i], params[comp].shape).astype(jnp.bfloat16)
        attn_masks[comp] = (frozen, baseline, wmask)

    mlp_keys = jax.random.split(ks[13], 2)
    mlp_masks = {
        "W_in": jax.random.uniform(mlp_keys[0], params["W_in"].shape).astype(jnp.bfloat16),
        "W_out": jax.random.uniform(mlp_keys[1], params["W_out"].shape).astype(jnp.bfloat16),
    }

    x = jax.random.normal(ks[14], (B, S, D), jnp.float32)

    out = weight_masked_layer_forward(x, params, attn_masks, mlp_masks)
    out = jax.block_until_ready(out)
    assert out.shape == (B, S, D) and bool(jnp.all(jnp.isfinite(out)))
    print("KERNEL_OK")
</pallas_src>

<mosaic_0001>
module attributes {stable_mosaic.version = 11 : i64} {
  func.func @_mask_weight_kernel(%arg0: memref<32x96xbf16, #tpu.memory_space<vmem>>, %arg1: memref<32x96xbf16, #tpu.memory_space<vmem>>, %arg2: memref<1x96xf32, #tpu.memory_space<vmem>>, %arg3: memref<1x96xf32, #tpu.memory_space<vmem>>, %arg4: memref<32x96xbf16, #tpu.memory_space<vmem>>) attributes {dimension_semantics = [], scalar_prefetch = 0 : i64, scratch_operands = 0 : i64, tpu.core_type = #tpu.core_type<tc>} {
    %c0 = arith.constant 0 : index
    %c0_0 = arith.constant 0 : index
    %0 = vector.load %arg2[%c0, %c0_0] : memref<1x96xf32, #tpu.memory_space<vmem>>, vector<1x96xf32>
    %c0_1 = arith.constant 0 : index
    %c0_2 = arith.constant 0 : index
    %1 = vector.load %arg3[%c0_1, %c0_2] : memref<1x96xf32, #tpu.memory_space<vmem>>, vector<1x96xf32>
    %c0_3 = arith.constant 0 : index
    %c0_4 = arith.constant 0 : index
    %2 = vector.load %arg1[%c0_3, %c0_4] : memref<32x96xbf16, #tpu.memory_space<vmem>>, vector<32x96xbf16>
    %3 = arith.extf %2 : vector<32x96xbf16> to vector<32x96xf32>
    %4 = vector.broadcast %1 : vector<1x96xf32> to vector<32x96xf32>
    %5 = arith.mulf %4, %3 : vector<32x96xf32>
    %6 = vector.broadcast %0 : vector<1x96xf32> to vector<32x96xf32>
    %7 = arith.addf %6, %5 : vector<32x96xf32>
    %c0_5 = arith.constant 0 : index
    %c0_6 = arith.constant 0 : index
    %8 = vector.load %arg0[%c0_5, %c0_6] : memref<32x96xbf16, #tpu.memory_space<vmem>>, vector<32x96xbf16>
    %9 = arith.extf %8 : vector<32x96xbf16> to vector<32x96xf32>
    %10 = arith.mulf %9, %7 : vector<32x96xf32>
    %11 = arith.truncf %10 : vector<32x96xf32> to vector<32x96xbf16>
    %c0_7 = arith.constant 0 : index
    %c0_8 = arith.constant 0 : index
    %12 = vector.load %arg4[%c0_7, %c0_8] : memref<32x96xbf16, #tpu.memory_space<vmem>>, vector<32x96xbf16>
    tpu.vector_store %arg4[%c0_7, %c0_8], %11 {strides = array<i32>} : memref<32x96xbf16, #tpu.memory_space<vmem>>, vector<32x96xbf16>,
    return
  }
}

</mosaic_0001>

<bundles_post_ra>
// kernel: tpu_custom_call.1
= control target key start
LH: loop header
LB: loop body
LE: loop exit
PB: predicated region body
PF: predicated region fallthrough
CT: control target
= control target key end

     0   :  { %9 = vsyncpa [#allocation3], 0  ;;  %s276_s0 = inlined_call_operand.hbm [shape: bf16[32,96], index: 0, kind: input, shape index: {}]   ;;  %s277_s1 = inlined_call_operand.hbm [shape: bf16[32,96], index: 1, kind: input, shape index: {}]   ;;  %s278_s2 = inlined_call_operand.vmem [shape: f32[1,96], index: 2, kind: input, shape index: {}]   ;;  %s279_s3 = inlined_call_operand.vmem [shape: f32[1,96], index: 3, kind: input, shape index: {}]   ;;  %s280_s4 = inlined_call_operand.hbm [shape: bf16[32,96], index: 4, kind: output, shape index: {}]  }
   0x1   :  { %10 = vsyncpa [#allocation6], 0 }
   0x2   :  { %11 = vsyncpa [#allocation4], 0  ;;  %s16_s17 = sshll.u32 %s276_s0, 4  ;;  %s218_s18 = smov [#allocation2]   ;;  %s17_s17 = int_to_ptr.hbm [resolvable:$true] %s16_s17 }
   0x3   :  { %s18_s19 = sshll.u32 %s218_s18, 4  ;;  %s29_s22 = sshll.u32 %s277_s1, 4  ;;  %s19_s19 = int_to_ptr.vmem [resolvable:$true] %s18_s19  ;;  %s30_s22 = int_to_ptr.hbm [resolvable:$true] %s29_s22 }
   0x4   :  { %s219_s23 = smov 64   ;;  %s220_s24 = smov 4  }
   0x5   :  { %24 = dma.hbm_to_vmem [thread:$0]  %s17_s17, 256, %s19_s19, [#allocation3], %s219_s23, %s219_s23, %s220_s24  }
   0x6   :  { %s221_s25 = smov [#allocation5]  }
   0x7   :  { %s31_s26 = sshll.u32 %s221_s25, 4  ;;  %s32_s26 = int_to_ptr.vmem [resolvable:$true] %s31_s26 }
   0x8   :  { %37 = dma.hbm_to_vmem [thread:$0]  %s30_s22, 256, %s32_s26, [#allocation6], %s219_s23, %s219_s23, %s220_s24  }
   0x9   :  { %212 = dma.done.wait [#allocation3], 256  }
   0xa   :  { %213 = vsyncadd [#allocation3], 4294967040 }
   0xb   :  { %214 = dma.done.wait [#allocation6], 256  }
   0xc   :  { %215 = vsyncadd [#allocation6], 4294967040  ;;  %v116_v0 = vld [vmem:[#allocation5] sm:$0xff]   ;;  %v138_v2 = vld [vmem:[%s279_s3] ss:$0 sm:$0xff]  ;;  %vm90_vm0 = vcmask 781312  }
   0xd   :  { %v117_v1 = vunpack.c.l.bf16 %v116_v0  ;;  %v139_v3 = vld [vmem:[%s278_s2] ss:$0 sm:$0xff]  ;;  %v118_v5 = vunpack.c.h.bf16 %v116_v0  ;;  %v131_v7 = vld [vmem:[#allocation5 + $0x8] sm:$0xff]   ;;  %v132_v8 = vld [vmem:[#allocation2 + $0x8] sm:$0xff]   ;;  %s222_s2 = smov [#allocation7]   ;;  %s101_s5 = sshll.u32 %s280_s4, 4  ;;  %s102_s5 = int_to_ptr.hbm [resolvable:$true] %s101_s5 }
   0xe   :  { %v124_v4 = vld [vmem:[#allocation2] sm:$0xff]   ;;  %v121_v12 = vunpack.c.l.bf16 %v131_v7  ;;  %v122_v13 = vunpack.c.h.bf16 %v131_v7  ;;  %v129_v17 = vunpack.c.l.bf16 %v132_v8  ;;  %v130_v19 = vunpack.c.h.bf16 %v132_v8  ;;  %s99_s3 = sshll.u32 %s222_s2, 4  ;;  %s100_s3 = int_to_ptr.vmem [resolvable:$true] %s99_s3 }
   0xf   :  { %v125_v6 = vunpack.c.l.bf16 %v124_v4  ;;  %v63_v9 = vmul.f32 %v138_v2, %v117_v1  ;;  %v64_v10 = vmul.f32 %v138_v2, %v118_v5  ;;  %v126_v11 = vunpack.c.h.bf16 %v124_v4 }
  0x10   :  { %v65_v16 = vmul.f32 %v138_v2, %v121_v12  ;;  %v66_v18 = vmul.f32 %v138_v2, %v122_v13 }
  0x11   :  { %v70_v14 = vadd.f32 %v139_v3, %v63_v9  ;;  %v71_v15 = vadd.f32 %v139_v3, %v64_v10 }
  0x12   :  { %v72_v22 = vadd.f32 %v139_v3, %v65_v16  ;;  %v73_v23 = vadd.f32 %v139_v3, %v66_v18 }
  0x13   :  { %v82_v20 = vmul.f32 %v125_v6, %v70_v14  ;;  %v83_v21 = vmul.f32 %v126_v11, %v71_v15 }
  0x14   :  { %v84_v26 = vmul.f32 %v129_v17, %v72_v22  ;;  %v85_v27 = vmul.f32 %v130_v19, %v73_v23 }
  0x15   :  { %v86_v24 = vpack.c.bf16 %v82_v20, %v82_v20  ;;  %v87_v25 = vpack.c.bf16 %v83_v21, %v83_v21 }
  0x16   :  { %v88_v28 = vpack.c.bf16 %v84_v26, %v84_v26  ;;  %v89_v29 = vpack.c.bf16 %v85_v27, %v85_v27 }
  0x17   :  { %91 = vst.msk [vmem:[#allocation7] sm:$0xf] %vm90_vm0, %v86_v24 }
  0x18   :  { %92 = vst.msk [vmem:[#allocation7 + $0x4] sm:$0xf] %vm90_vm0, %v87_v25 }
  0x19   :  { %93 = vst.msk [vmem:[#allocation7 + $0x8] sm:$0xf] %vm90_vm0, %v88_v28 }
  0x1a   :  { %94 = vst.msk [vmem:[#allocation7 + $0xc] sm:$0xf] %vm90_vm0, %v89_v29 }
  0x1b   :  { %107 = dma.vmem_to_hbm [thread:$0]  %s100_s3, 256, %s102_s5, [#allocation4], %s219_s23, %s219_s23, %s220_s24  }
  0x1c   :  { %216 = dma.done.wait [#allocation4], 256  }
  0x1d   :  { %217 = vsyncadd [#allocation4], 4294967040 }
  0x1e   :  { %112 = vsyncpa [#allocation3], 1 }
  0x1f   :  { %113 = vsyncpa [#allocation6], 1 }
  0x20   :  { %114 = vsyncpa [#allocation4], 1 }

</bundles_post_ra>
